<compile_context>
chip_gen: v7x
topology: tpu7x:2x2x1
jax: 0.10.0
libtpu: 0.0.40
codegen_flags: <defaults>
</compile_context>

<pallas_src>
import functools

import jax
import jax.numpy as jnp
from jax import lax
from jax.experimental import pallas as pl
from jax.experimental.pallas import tpu as pltpu

_LANE = 128
_TILE_B = 4096        # max batch rows per grid step (f32: 2 MiB in-tile)
_CHUNK_B = 128        # rows per in-kernel chunk (multiple of 8/16/128)
_SMALL_ELEMS = 1 << 14  # below this, a plain XLA slice beats a kernel launch

# Shapes/dtypes for which the lane-dense variant failed to lower (fallback memo).
_lane_dense_bad = set()


def _round_up(x, m):
    return ((x + m - 1) // m) * m


def _feature_block(features, literal_index):
    """(block width, feature-block index, column inside the block)."""
    if features <= _LANE:
        return features, 0, literal_index
    return _LANE, literal_index // _LANE, literal_index % _LANE


def _batch_tile(batch):
    """Rows per grid step: as large as reasonable (amortize per-step overhead)
    but keeping >= 2 grid steps so v7x's 2 TensorCores both get work; multiple
    of 128 so the in-kernel chunk loop and lane-dense output tile exactly."""
    if batch < _LANE:
        return batch
    return max(_LANE, min(_TILE_B, _round_up(pl.cdiv(batch, 2), _LANE)))


def _literal_kernel_lane_dense(x_ref, o_ref, *, col_in_block, negated, chunk):
    """Lane-dense variant: o_ref[0, 0, b] = (+/-) x_ref[b, col_in_block].

    Per 128-row chunk: load (chunk, feat_blk), transpose on the XLU (idle
    otherwise, hidden under the input DMA), take the literal row, negate
    statically, store a dense (1, 1, chunk) lane-major slice.
    """
    tile_b = x_ref.shape[0]

    @pl.loop(0, tile_b // chunk)
    def _(j):
        r = pl.multiple_of(j * chunk, chunk)
        blk_t = jnp.transpose(x_ref[pl.ds(r, chunk), :])      # (feat_blk, chunk)
        row = blk_t[col_in_block:col_in_block + 1, :]          # (1, chunk)
        if negated:
            row = -row
        o_ref[:, :, pl.ds(r, chunk)] = row[None]               # (1, 1, chunk)


def _literal_kernel_col(x_ref, o_ref, *, col_in_block, negated, chunk):
    """Fallback variant: natural (tile_b, 1) output (width-1 masked stores).

    Chunked so live vreg count stays small even for large batch tiles.
    """
    tile_b = x_ref.shape[0]

    @pl.loop(0, tile_b // chunk)
    def _(j):
        r = pl.multiple_of(j * chunk, chunk)
        col = x_ref[pl.ds(r, chunk), pl.ds(col_in_block, 1)]   # (chunk, 1)
        o_ref[pl.ds(r, chunk), :] = (-col) if negated else col


def _pallas_forward(x, literal_index, negated, *, lane_dense):
    batch, features = x.shape
    feat_block, feat_block_idx, col_in_block = _feature_block(features, literal_index)
    tile_b = _batch_tile(batch)
    chunk = min(_CHUNK_B, tile_b)
    grid_b = pl.cdiv(batch, tile_b)

    in_spec = pl.BlockSpec((tile_b, feat_block), lambda i: (i, feat_block_idx))
    params = pltpu.CompilerParams(dimension_semantics=("parallel",))

    if lane_dense:
        kernel = functools.partial(
            _literal_kernel_lane_dense,
            col_in_block=col_in_block, negated=bool(negated), chunk=chunk)
        out3 = pl.pallas_call(
            kernel,
            out_shape=jax.ShapeDtypeStruct((grid_b, 1, tile_b), x.dtype),
            grid=(grid_b,),
            in_specs=[in_spec],
            out_specs=pl.BlockSpec((1, 1, tile_b), lambda i: (i, 0, 0)),
            compiler_params=params,
        )(x)
        # Lane-major slab -> [batch, 1]; padded rows of the last (possibly
        # partial) batch tile are dropped by the slice.
        return out3.reshape(grid_b * tile_b)[:batch][:, None]

    kernel = functools.partial(
        _literal_kernel_col,
        col_in_block=col_in_block, negated=bool(negated), chunk=chunk)
    return pl.pallas_call(
        kernel,
        out_shape=jax.ShapeDtypeStruct((batch, 1), x.dtype),
        grid=(grid_b,),
        in_specs=[in_spec],
        out_specs=pl.BlockSpec((tile_b, 1), lambda i: (i, 0)),
        compiler_params=params,
    )(x)


def literal_node_forward(x, literal_index, negated=False, *, force_pallas=False):
    """Pallas implementation of LiteralNodeModule.forward.

    Args:
      x: [batch, features] array.
      literal_index: static int feature column to select.
      negated: static bool; multiply by -1 if True.
      force_pallas: skip the small-input XLA fast path (testing/benchmarks).

    Returns:
      [batch, 1] array, same dtype as x.
    """
    batch, features = x.shape
    literal_index = int(literal_index)
    if not 0 <= literal_index < features:
        raise ValueError(
            f"literal_index {literal_index} out of range for {features} features")

    # Tiny-input fast path: a pallas_call costs ~1 us of launch/DMA setup while
    # XLA fuses a static slice (+negate) for free.
    if not force_pallas and (batch * features <= _SMALL_ELEMS or batch < _LANE):
        col = lax.slice(x, (0, literal_index), (batch, literal_index + 1))
        return -col if negated else col

    key = (batch, features, str(x.dtype))
    if key not in _lane_dense_bad:
        try:
            return _pallas_forward(x, literal_index, negated, lane_dense=True)
        except Exception:  # lowering fallback only; numerics are identical.
            _lane_dense_bad.add(key)
    # TODO(synk): drop this fallback once (chunk, feat) transposes are confirmed
    # to lower for all dtypes of interest on the target Mosaic toolchain.
    return _pallas_forward(x, literal_index, negated, lane_dense=False)

    # TODO(synk): when many literal indices are evaluated over the same x, fuse
    # them into one kernel: build a +/-one-hot selection matrix S [F, L_pad128]
    # and run a tiled MXU matmul x @ S (lane-dense [B, L] output, one pass over
    # x instead of L passes). Not part of this module's single-literal forward.


def _reference(x, literal_index, negated):
    return x[:, literal_index][:, None] * (-1 if negated else 1)


if __name__ == "__main__":
    key = jax.random.PRNGKey(0)
    k0, k1, k2 = jax.random.split(key, 3)

    # --- Typical module shapes (batch=2, features=8): XLA fast path ---
    x_small = jax.random.normal(k0, (2, 8), dtype=jnp.float32)

    out_neg = jax.block_until_ready(literal_node_forward(x_small, 3, negated=True))
    assert out_neg.shape == (2, 1)
    assert jnp.allclose(out_neg, _reference(x_small, 3, True))

    out_pos = jax.block_until_ready(literal_node_forward(x_small, 1, negated=False))
    assert jnp.allclose(out_pos, _reference(x_small, 1, False))

    # Same tiny case forced through the Pallas kernel.
    out_forced = jax.block_until_ready(
        literal_node_forward(x_small, 3, negated=True, force_pallas=True))
    assert jnp.allclose(out_forced, _reference(x_small, 3, True))

    # --- Pallas path: batch tiling (non-multiple of the tile), literal in the
    #     third 128-lane feature tile, negated ---
    x_big = jax.random.normal(k1, (1040, 300), dtype=jnp.float32)
    out_big = jax.block_until_ready(literal_node_forward(x_big, 257, negated=True))
    assert out_big.shape == (1040, 1)
    assert jnp.allclose(out_big, _reference(x_big, 257, True))

    # Also exercise the width-1 fallback kernel explicitly.
    out_fb = jax.block_until_ready(
        _pallas_forward(x_big, 257, True, lane_dense=False))
    assert jnp.allclose(out_fb, _reference(x_big, 257, True))

    # --- bf16 path: packed copy/negate, no f32 promotion of stored values ---
    x_bf16 = jax.random.normal(k2, (2048, 256), dtype=jnp.bfloat16)
    out_bf16 = jax.block_until_ready(literal_node_forward(x_bf16, 200, negated=True))
    assert out_bf16.dtype == jnp.bfloat16
    assert jnp.array_equal(out_bf16, _reference(x_bf16, 200, True))

    print("KERNEL_OK")
</pallas_src>

<mosaic_0001>
module attributes {stable_mosaic.version = 11 : i64} {
  func.func @_literal_kernel_lane_dense(%arg0: i32, %arg1: memref<2x8xf32, #tpu.memory_space<vmem>>, %arg2: memref<1x1x2xf32, #tpu.memory_space<vmem>>) attributes {dimension_semantics = [#tpu.dimension_semantics<parallel>], iteration_bounds = array<i64: 1>, scalar_prefetch = 0 : i64, scratch_operands = 0 : i64, tpu.core_type = #tpu.core_type<tc>, window_params = [{transform_indices = @transform_0, window_bounds = array<i64: 2, 8>}, {transform_indices = @transform_1, window_bounds = array<i64: 1, 1, 2>}]} {
    %c0_i32 = arith.constant 0 : i32
    %c1_i32 = arith.constant 1 : i32
    %0 = arith.muli %c0_i32, %c1_i32 : i32
    %c0_i32_0 = arith.constant 0 : i32
    %1 = arith.addi %c0_i32_0, %0 : i32
    %c2_i32 = arith.constant 2 : i32
    %2 = arith.muli %1, %c2_i32 : i32
    %3 = tpu.assume_multiple %2, 2 : i32
    %4 = arith.index_cast %3 : i32 to index
    %c0 = arith.constant 0 : index
    %5 = vector.load %arg1[%4, %c0] : memref<2x8xf32, #tpu.memory_space<vmem>>, vector<2x8xf32>
    %6 = tpu.transpose %5, [1, 0] : vector<2x8xf32> -> vector<8x2xf32>
    %7 = vector.extract_strided_slice %6 {offsets = [3, 0], sizes = [1, 2], strides = [1, 1]} : vector<8x2xf32> to vector<1x2xf32>
    %cst = arith.constant 0.000000e+00 : f32
    %8 = vector.broadcast %cst : f32 to vector<1x2xf32>
    %9 = arith.subf %8, %7 : vector<1x2xf32>
    %10 = vector.shape_cast %9 : vector<1x2xf32> to vector<1x1x2xf32>
    %c0_1 = arith.constant 0 : index
    %c0_2 = arith.constant 0 : index
    %11 = arith.index_cast %3 : i32 to index
    %12 = vector.load %arg2[%c0_1, %c0_2, %11] : memref<1x1x2xf32, #tpu.memory_space<vmem>>, vector<1x1x2xf32>
    tpu.vector_store %arg2[%c0_1, %c0_2, %11], %10 {strides = array<i32>} : memref<1x1x2xf32, #tpu.memory_space<vmem>>, vector<1x1x2xf32>,
    %c1_i32_3 = arith.constant 1 : i32
    return
  }
  func.func @transform_0(%arg0: i32) -> (i32, i32) {
    %c0_i32 = arith.constant 0 : i32
    %c0_i32_0 = arith.constant 0 : i32
    return %arg0, %c0_i32 : i32, i32
  }
  func.func @transform_1(%arg0: i32) -> (i32, i32, i32) {
    %c0_i32 = arith.constant 0 : i32
    %c0_i32_0 = arith.constant 0 : i32
    %c0_i32_1 = arith.constant 0 : i32
    return %arg0, %c0_i32, %c0_i32_0 : i32, i32, i32
  }
}

module attributes {stable_mosaic.version = 11 : i64} {
  func.func @_literal_kernel_col(%arg0: i32, %arg1: memref<2x8xf32, #tpu.memory_space<vmem>>, %arg2: memref<2x1xf32, #tpu.memory_space<vmem>>) attributes {dimension_semantics = [#tpu.dimension_semantics<parallel>], iteration_bounds = array<i64: 1>, scalar_prefetch = 0 : i64, scratch_operands = 0 : i64, tpu.core_type = #tpu.core_type<tc>, window_params = [{transform_indices = @transform_0, window_bounds = array<i64: 2, 8>}, {transform_indices = @transform_1, window_bounds = array<i64: 2, 1>}]} {
    %c0_i32 = arith.constant 0 : i32
    %c1_i32 = arith.constant 1 : i32
    %0 = arith.muli %c0_i32, %c1_i32 : i32
    %c0_i32_0 = arith.constant 0 : i32
    %1 = arith.addi %c0_i32_0, %0 : i32
    %c2_i32 = arith.constant 2 : i32
    %2 = arith.muli %1, %c2_i32 : i32
    %3 = tpu.assume_multiple %2, 2 : i32
    %4 = arith.index_cast %3 : i32 to index
    %c3 = arith.constant 3 : index
    %5 = vector.load %arg1[%4, %c3] : memref<2x8xf32, #tpu.memory_space<vmem>>, vector<2x1xf32>
    %cst = arith.constant 0.000000e+00 : f32
    %6 = vector.broadcast %cst : f32 to vector<2x1xf32>
    %7 = arith.subf %6, %5 : vector<2x1xf32>
    %8 = arith.index_cast %3 : i32 to index
    %c0 = arith.constant 0 : index
    %9 = vector.load %arg2[%8, %c0] : memref<2x1xf32, #tpu.memory_space<vmem>>, vector<2x1xf32>
    tpu.vector_store %arg2[%8, %c0], %7 {strides = array<i32>} : memref<2x1xf32, #tpu.memory_space<vmem>>, vector<2x1xf32>,
    %c1_i32_1 = arith.constant 1 : i32
    return
  }
  func.func @transform_0(%arg0: i32) -> (i32, i32) {
    %c0_i32 = arith.constant 0 : i32
    %c0_i32_0 = arith.constant 0 : i32
    return %arg0, %c0_i32 : i32, i32
  }
  func.func @transform_1(%arg0: i32) -> (i32, i32) {
    %c0_i32 = arith.constant 0 : i32
    %c0_i32_0 = arith.constant 0 : i32
    return %arg0, %c0_i32 : i32, i32
  }
}

</mosaic_0001>

<bundles_post_ra>
// kernel: tpu_custom_call.1
= control target key start
LH: loop header
LB: loop body
LE: loop exit
PB: predicated region body
PF: predicated region fallthrough
CT: control target
= control target key end

     0   :  { %6 = vsyncpa [#allocation3], 0  ;;  %s59_s6 = smov [#allocation2]   ;;  %s86_s0 = inlined_call_operand.hbm [shape: f32[2,8], index: 0, kind: input, shape index: {}]   ;;  %s87_s1 = inlined_call_operand.vmem [shape: f32[2,1], index: 1, kind: output, shape index: {}]  }
   0x1   :  { %s13_s7 = sshll.u32 %s59_s6, 4  ;;  %s35_s10 = scalar_lea.hbm %s86_s0, 32  ;;  %s14_s7 = int_to_ptr.vmem [resolvable:$true] %s13_s7 }
   0x2   :  { %p36_p0 = scmp.ne.s32.totalorder %s86_s0, %s35_s10  ;;  %p39_p1 = scmp.lt.u32.totalorder %s35_s10, %s86_s0 }
   0x4   :  { %p41_p2 = pnand %p39_p1, %p36_p0 }
   0x6   :  { %44 = shalt.err (!%p41_p2)
}
   0x7   :  { %s45_s15 = scalar_lea.vmem %s14_s7, 32  ;;  %p50_p4 = scmp.lt.s32.totalorder %s14_s7, %s14_s7 }
   0x8   :  { %p46_p3 = scmp.ne.s32.totalorder %s14_s7, %s45_s15  ;;  %p51_p5 = scmp.lt.s32.totalorder %s45_s15, %s45_s15 }
   0xa   :  { %p52_p6 = por %p51_p5, %p50_p4 }
   0xc   :  { %p53_p7 = pnand %p52_p6, %p46_p3 }
   0xe   :  { %56 = shalt.err (!%p53_p7)
}
   0xf   :  { %16 = dma.hbm_to_vmem [thread:$0]  %s86_s0, 32, %s14_s7, [#allocation3]  }
  0x10   :  { %57 = dma.done.wait [#allocation3], 32  }
  0x11   :  { %58 = vsyncadd [#allocation3], 4294967264  ;;  %v20_v0 = vld [vmem:[#allocation2] sm:$0x3]  ;;  %s60_s18 = smov 125   ;;  %vm26_vm0 = vcmask 1024  }
  0x12   :  { %v21_v1 = vsub.f32 0.0, %v20_v0 }
  0x14   :  { %23 = vrot.lane.b32.xlu0 %v21_v1, %s60_s18 }
  0x86   :  { %v24_v2 = vpop.permute.xlu0 %23 }
  0x87   :  { %27 = vst.msk [vmem:[%s87_s1] sm:$0x3] %vm26_vm0, %v24_v2 }
  0x88   :  { %32 = vsyncpa [#allocation3], 1 }

</bundles_post_ra>
